<compile_context>
chip_gen: v7x
topology: tpu7x:2x2x1
jax: 0.10.0
libtpu: 0.0.40
codegen_flags: <defaults>
</compile_context>

<pallas_src>
import functools

import jax
import jax.numpy as jnp
from jax.experimental import pallas as pl
from jax.experimental.pallas import tpu as pltpu

_EPS = 1e-6  # PyTorch PairwiseDistance default eps (added to the difference)


def _round_up(x, m):
    return ((x + m - 1) // m) * m


def _cdiv(a, b):
    return -(-a // b)


def _pick_pack_factor(M, D, max_width=2048):
    """Lane-packing factor k: must divide M (so packing is a free contiguous
    reshape, never a pad/slice copy), maximising lane occupancy of k*D."""
    if D >= 128 or M <= 1:
        return 1
    best_k, best_occ = 1, D / float(_round_up(D, 128))
    for k in range(2, max_width // D + 1):
        if M % k:
            continue
        dp = k * D
        occ = dp / float(_round_up(dp, 128))
        if occ > best_occ + 1e-9:
            best_k, best_occ = k, occ
    return best_k


def _vmem_budget_bytes():
    """Per-generation scoped-VMEM budget with headroom for Mosaic scratch."""
    kind = ""
    try:
        kind = jax.devices()[0].device_kind.lower()
    except Exception:
        pass
    cap = 0
    try:
        cap = int(pltpu.get_tpu_info().vmem_capacity_bytes)
    except Exception:
        cap = 0
    if cap <= 0:
        cap = 128 * 1024 * 1024 if ("v5" in kind or "v6" in kind) else 64 * 1024 * 1024
    if "v7" in kind:                      # v7x VMEM is 64 MiB per TensorCore
        cap = min(cap, 64 * 1024 * 1024)
    cap = min(cap, 128 * 1024 * 1024)
    return (cap * 3) // 4                 # headroom for outputs / internal scratch


def _euclid_loss_kernel(*refs, k, tm, valid_rows):
    """One grid step: partial sum of per-row L2 distances over a (tm, Dp) tile."""
    if k > 1:
        out_ref, lab_ref, gmat_ref, part_ref = refs
    else:
        out_ref, lab_ref, part_ref = refs
        gmat_ref = None

    # Cast to f32 only after the DMA (inputs may be bf16 in HBM).
    diff = out_ref[...].astype(jnp.float32) - lab_ref[...].astype(jnp.float32) + _EPS
    d2 = diff * diff                                              # (tm, Dp)

    if gmat_ref is not None:
        # Segmented lane reduction (k original rows per packed VMEM row) via a
        # small block-diagonal matmul on the otherwise-idle MXU.
        sq = jnp.dot(d2, gmat_ref[...], preferred_element_type=jnp.float32)  # (tm, k)
    else:
        sq = jnp.sum(d2, axis=-1, keepdims=True)                  # (tm, 1)

    dist = jnp.sqrt(sq)

    def _store(vals):
        # Per-block partial sum, broadcast into a lane-dense (1, 8, 128) tile.
        part_ref[...] = jnp.zeros(part_ref.shape, jnp.float32) + jnp.sum(vals)

    if valid_rows % tm == 0:
        # Every tile is fully in-bounds: no masking anywhere at runtime.
        _store(dist)
    else:
        b = pl.program_id(0)
        last = pl.num_programs(0) - 1

        @pl.when(b != last)
        def _():
            _store(dist)

        @pl.when(b == last)
        def _():
            # Only the last tile straddles the end of the packed array; rows
            # past `valid_rows` hold unspecified data (possibly NaN after the
            # sqrt) and are selected away here.
            rows = b * tm + jax.lax.broadcasted_iota(jnp.int32, dist.shape, 0)
            _store(jnp.where(rows < valid_rows, dist, 0.0))


def euclidian_loss(outputs, labels, *, tm=None, min_blocks=4):
    """Pallas implementation of EuclidianLoss.forward.

    outputs: [B, N, D] (or already-2D [M, D]);  labels: [B, N, D]
    returns: ({'distance_loss': scalar}, memory-dict analog)
    """
    # Glue equivalent to torch flatten(end_dim=1).
    labels2d = labels.reshape((-1,) + labels.shape[2:])
    outputs2d = outputs if outputs.ndim == 2 else outputs.reshape((-1,) + outputs.shape[2:])
    assert outputs2d.shape == labels2d.shape, (outputs2d.shape, labels2d.shape)

    # TODO(synk): torch module stores .detach()'d tensors on self.memory; here
    # we return the flattened arrays in an equivalent dict (no Pallas needed).
    memory = {
        "points": {"target": labels2d, "pred": outputs2d},
        "box": {"target": None, "pred": None},
    }

    # PairwiseDistance reduces over the last axis; all leading axes are rows.
    D = labels2d.shape[-1]
    out_rows = outputs2d.reshape(-1, D)
    lab_rows = labels2d.reshape(-1, D)
    M = out_rows.shape[0]
    if M == 0:
        return {"distance_loss": jnp.float32(float("nan"))}, memory

    itemsize = jnp.dtype(out_rows.dtype).itemsize

    # Lane-dense packing: k original rows per packed VMEM row.  k divides M, so
    # the reshape below is a pure contiguous view (no pad / slice / HBM copy).
    k = _pick_pack_factor(M, D)
    Dp = k * D
    Mp = M // k
    out_packed = out_rows.reshape(Mp, Dp)
    lab_packed = lab_rows.reshape(Mp, Dp)

    # Block-diagonal lane-group reduction matrix (hoisted; DMA'd once).
    gmat = None
    if k > 1:
        gmat = (jax.lax.broadcasted_iota(jnp.int32, (Dp, k), 0) // D
                == jax.lax.broadcasted_iota(jnp.int32, (Dp, k), 1)).astype(jnp.float32)

    # Row-tile sizing from the actual on-chip footprint:
    #   2 inputs x 2 pipeline buffers x tm x round_up(Dp, 128) lanes (+ gmat).
    lane_w = _round_up(Dp, 128)
    sub = {4: 8, 2: 16, 1: 32}.get(itemsize, 8)
    vmem_limit = _vmem_budget_bytes()
    fixed = 4 * 1024 * 1024                      # output tiles + internal scratch headroom
    if k > 1:
        fixed += 2 * Dp * _round_up(k, 128) * 4  # double-buffered, lane-padded gmat
    per_row = 2 * 2 * lane_w * itemsize          # 2 inputs x double buffer
    tm_cap = max(sub, ((vmem_limit - fixed) // per_row) // sub * sub)
    tm_cap = min(tm_cap, 32768)

    if tm is None:
        # Biggest tile within budget, but keep >= min_blocks tiles so the
        # "parallel" axis has work to shard across v7x's two TensorCores.
        tm = min(tm_cap, max(sub, _cdiv(Mp, min_blocks)))
    tm = min(tm, Mp)
    if tm < Mp:
        tm = max(sub, (tm // sub) * sub)         # sublane-aligned unless tm == full dim
    nblocks = _cdiv(Mp, tm)

    in_specs = [
        pl.BlockSpec((tm, Dp), lambda b: (b, 0)),
        pl.BlockSpec((tm, Dp), lambda b: (b, 0)),
    ]
    args = [out_packed, lab_packed]
    if k > 1:
        in_specs.append(pl.BlockSpec((Dp, k), lambda b: (0, 0)))  # VMEM-resident
        args.append(gmat)

    kernel = functools.partial(_euclid_loss_kernel, k=k, tm=tm, valid_rows=Mp)

    matmul_flops = 2 * Mp * Dp * k if k > 1 else 0
    cost = pl.CostEstimate(
        flops=int(4 * M * D + M + matmul_flops),
        transcendentals=int(M),
        bytes_accessed=int(2 * M * D * itemsize + nblocks * 8 * 128 * 4
                           + (Dp * k * 4 if k > 1 else 0)),
    )

    partials = pl.pallas_call(
        kernel,
        out_shape=jax.ShapeDtypeStruct((nblocks, 8, 128), jnp.float32),
        grid_spec=pltpu.PrefetchScalarGridSpec(
            num_scalar_prefetch=0,
            grid=(nblocks,),
            in_specs=in_specs,
            out_specs=pl.BlockSpec((1, 8, 128), lambda b: (b, 0, 0)),
        ),
        compiler_params=pltpu.CompilerParams(
            # Single "parallel" axis: independent output block per step, so
            # Mosaic may shard it across both v7x TCs; on v5e/v6e it is a
            # plain sequential loop (no padding / duplicate finalize).
            # TODO(synk): verify with xprof that the axis actually splits on
            # v7x; if not, switch to pltpu.CORE_PARALLEL or pl.core_map.
            dimension_semantics=("parallel",),
            vmem_limit_bytes=int(vmem_limit),
        ),
        cost_estimate=cost,
    )(*args)

    distance_loss = jnp.sum(partials[:, 0, 0]) / jnp.float32(M)
    return {"distance_loss": distance_loss}, memory


def _reference(outputs, labels):
    D = labels.shape[-1]
    diff = (outputs.reshape(-1, D).astype(jnp.float32)
            - labels.reshape(-1, D).astype(jnp.float32) + _EPS)
    return jnp.sqrt(jnp.sum(diff * diff, axis=-1)).mean()


if __name__ == "__main__":
    key = jax.random.PRNGKey(0)

    cases = [
        (2, 8, 32),    # packed (k=4), single whole-array tile
        (3, 5, 48),    # packed with a non-trivial divisor factor (k=5)
        (4, 150, 32),  # multi-tile grid with a masked ragged tail
        (2, 12, 128),  # un-packed path (k=1), multi-tile, no mask
    ]
    for idx, (B, N, D) in enumerate(cases):
        k1, k2 = jax.random.split(jax.random.fold_in(key, idx))
        outputs = jax.random.normal(k1, (B, N, D), dtype=jnp.float32)
        labels = jax.random.normal(k2, (B, N, D), dtype=jnp.float32)

        loss_dict, _memory = euclidian_loss(outputs, labels)
        got = jax.block_until_ready(loss_dict["distance_loss"])
        ref = _reference(outputs, labels)
        assert jnp.allclose(got, ref, rtol=1e-5, atol=1e-5), (idx, got, ref)

    print("KERNEL_OK")
</pallas_src>

<mosaic_0001>
module attributes {stable_mosaic.version = 11 : i64} {
  func.func @_euclid_loss_kernel(%arg0: i32, %arg1: memref<4x128xf32, #tpu.memory_space<vmem>>, %arg2: memref<4x128xf32, #tpu.memory_space<vmem>>, %arg3: memref<128x4xf32, #tpu.memory_space<vmem>>, %arg4: memref<1x8x128xf32, #tpu.memory_space<vmem>>) attributes {dimension_semantics = [#tpu.dimension_semantics<parallel>], iteration_bounds = array<i64: 1>, scalar_prefetch = 0 : i64, scratch_operands = 0 : i64, tpu.core_type = #tpu.core_type<tc>, window_params = [{transform_indices = @transform_0, window_bounds = array<i64: 4, 128>}, {transform_indices = @transform_1, window_bounds = array<i64: 4, 128>}, {pipeline_mode = #tpu.pipeline_mode<synchronous>, transform_indices = @transform_2, window_bounds = array<i64: 128, 4>}, {transform_indices = @transform_3, window_bounds = array<i64: 1, 8, 128>}]} {
    %c0 = arith.constant 0 : index
    %c0_0 = arith.constant 0 : index
    %0 = vector.load %arg1[%c0, %c0_0] : memref<4x128xf32, #tpu.memory_space<vmem>>, vector<4x128xf32>
    %c0_1 = arith.constant 0 : index
    %c0_2 = arith.constant 0 : index
    %1 = vector.load %arg2[%c0_1, %c0_2] : memref<4x128xf32, #tpu.memory_space<vmem>>, vector<4x128xf32>
    %2 = arith.subf %0, %1 : vector<4x128xf32>
    %cst = arith.constant 9.99999997E-7 : f32
    %3 = vector.broadcast %cst : f32 to vector<4x128xf32>
    %4 = arith.addf %2, %3 : vector<4x128xf32>
    %5 = arith.mulf %4, %4 : vector<4x128xf32>
    %c0_3 = arith.constant 0 : index
    %c0_4 = arith.constant 0 : index
    %6 = vector.load %arg3[%c0_3, %c0_4] : memref<128x4xf32, #tpu.memory_space<vmem>>, vector<128x4xf32>
    %cst_5 = arith.constant dense<0.000000e+00> : vector<4x4xf32>
    %7 = tpu.matmul %5, %6, %cst_5 {dimension_numbers = #tpu.dot_dimension_numbers<[1], [0], [0], [1], [0, 0, 1, 1], [], []>} : vector<4x128xf32>, vector<128x4xf32>, vector<4x4xf32> -> vector<4x4xf32>
    %8 = math.sqrt %7 : vector<4x4xf32>
    %cst_6 = arith.constant 0.000000e+00 : f32
    %9 = vector.broadcast %cst_6 : f32 to vector<1x8x128xf32>
    %10 = vector.shape_cast %8 : vector<4x4xf32> to vector<1x4x4xf32>
    %cst_7 = arith.constant dense<0.000000e+00> : vector<1xf32>
    %11 = vector.multi_reduction <add>, %10, %cst_7 [1, 2] : vector<1x4x4xf32> to vector<1xf32>
    %12 = vector.shape_cast %11 : vector<1xf32> to vector<1x1x1xf32>
    %13 = vector.extract %12[0, 0, 0] : f32 from vector<1x1x1xf32>
    %14 = vector.broadcast %13 : f32 to vector<1x8x128xf32>
    %15 = arith.addf %9, %14 : vector<1x8x128xf32>
    %c0_8 = arith.constant 0 : index
    %c0_9 = arith.constant 0 : index
    %c0_10 = arith.constant 0 : index
    %16 = vector.load %arg4[%c0_8, %c0_9, %c0_10] : memref<1x8x128xf32, #tpu.memory_space<vmem>>, vector<1x8x128xf32>
    tpu.vector_store %arg4[%c0_8, %c0_9, %c0_10], %15 {strides = array<i32>} : memref<1x8x128xf32, #tpu.memory_space<vmem>>, vector<1x8x128xf32>,
    return
  }
  func.func @transform_0(%arg0: i32) -> (i32, i32) {
    %c0_i32 = arith.constant 0 : i32
    %c0_i32_0 = arith.constant 0 : i32
    return %arg0, %c0_i32 : i32, i32
  }
  func.func @transform_1(%arg0: i32) -> (i32, i32) {
    %c0_i32 = arith.constant 0 : i32
    %c0_i32_0 = arith.constant 0 : i32
    return %arg0, %c0_i32 : i32, i32
  }
  func.func @transform_2(%arg0: i32) -> (i32, i32) {
    %c0_i32 = arith.constant 0 : i32
    %c0_i32_0 = arith.constant 0 : i32
    %c0_i32_1 = arith.constant 0 : i32
    return %c0_i32, %c0_i32_0 : i32, i32
  }
  func.func @transform_3(%arg0: i32) -> (i32, i32, i32) {
    %c0_i32 = arith.constant 0 : i32
    %c0_i32_0 = arith.constant 0 : i32
    %c0_i32_1 = arith.constant 0 : i32
    return %arg0, %c0_i32, %c0_i32_0 : i32, i32, i32
  }
}

</mosaic_0001>

<bundles_post_ra>
// kernel: tpu_custom_call.1
= control target key start
LH: loop header
LB: loop body
LE: loop exit
PB: predicated region body
PF: predicated region fallthrough
CT: control target
= control target key end

     0   :  { %v249_v3 = vmov 0.0|0.0   ;;  %vm250_vm0 = vmmov 0   ;;  %v251_v6 = vmov 0.0   ;;  %s339_s0 = inlined_call_operand.vmem [shape: f32[4,128], index: 0, kind: input, shape index: {}]   ;;  %s340_s1 = inlined_call_operand.vmem [shape: f32[4,128], index: 1, kind: input, shape index: {}]   ;;  %s341_s2 = inlined_call_operand.vmem [shape: f32[128,4], index: 2, kind: input, shape index: {}]   ;;  %s342_s3 = inlined_call_operand.hbm [shape: f32[1,8,128], index: 3, kind: output, shape index: {}]  }
   0x1   :  { %v20_v0 = vld [vmem:[%s341_s2] sm:$0xff]  ;;  %v21_v1 = vld [vmem:[%s341_s2 + $0x8] sm:$0xff]  ;;  %v22_v2 = vld [vmem:[%s341_s2 + $0x10] sm:$0xff]  ;;  %193 = vmatprep.subr.bf16.mxu0 %v249_v3  ;;  %190 = vmatprep.mubr.msk.f32.mxu0 %vm250_vm0, %v251_v6 }
   0x2   :  { %v194_v4 = vpack.c.bf16 %v21_v1, %v20_v0  ;;  %v23_v5 = vld [vmem:[%s341_s2 + $0x18] sm:$0xff]  ;;  %v24_v8 = vld [vmem:[%s341_s2 + $0x20] sm:$0xff]  ;;  %v25_v9 = vld [vmem:[%s341_s2 + $0x28] sm:$0xff] }
   0x3   :  { %v197_v7 = vpack.c.bf16 %v23_v5, %v22_v2 }
   0x4   :  { %195 = vmatpush3.bf16.msra.mxu0 %v194_v4 }
   0x5   :  { %196 = vmatprep.subr.bf16.mxu0 %v249_v3 }
   0x6   :  { %8 = vsyncpa [#allocation3], 0  ;;  %v200_v10 = vpack.c.bf16 %v25_v9, %v24_v8  ;;  %v26_v11 = vld [vmem:[%s341_s2 + $0x30] sm:$0xff]  ;;  %v27_v12 = vld [vmem:[%s341_s2 + $0x38] sm:$0xff]  ;;  %vm113_vm2 = vcmask 27648  }
   0x7   :  { %v203_v13 = vpack.c.bf16 %v27_v12, %v26_v11  ;;  %v28_v14 = vld [vmem:[%s341_s2 + $0x40] sm:$0xff]  ;;  %v29_v15 = vld [vmem:[%s341_s2 + $0x48] sm:$0xff]  ;;  %v30_v17 = vld [vmem:[%s341_s2 + $0x50] sm:$0xff] }
   0x8   :  { %198 = vmatpush3.bf16.msra.mxu0 %v197_v7  ;;  %v206_v16 = vpack.c.bf16 %v29_v15, %v28_v14  ;;  %v31_v18 = vld [vmem:[%s341_s2 + $0x58] sm:$0xff]  ;;  %v15_v20 = vld [vmem:[%s339_s0] sm:$0xf]  ;;  %v33_v23 = vld [vmem:[%s341_s2 + $0x68] sm:$0xff] }
   0x9   :  { %199 = vmatprep.subr.bf16.mxu0 %v249_v3  ;;  %v209_v19 = vpack.c.bf16 %v31_v18, %v30_v17  ;;  %v16_v21 = vld [vmem:[%s340_s1] sm:$0xf]  ;;  %v34_v26 = vld [vmem:[%s341_s2 + $0x70] sm:$0xff]  ;;  %v35_v27 = vld [vmem:[%s341_s2 + $0x78] sm:$0xff]  ;;  %s252_s1 = smov [#allocation2]  }
   0xa   :  { %v32_v22 = vld [vmem:[%s341_s2 + $0x60] sm:$0xff]  ;;  %v17_v24 = vsub.f32 %v15_v20, %v16_v21  ;;  %v215_v29 = vpack.c.bf16 %v35_v27, %v34_v26  ;;  %s133_s2 = sshll.u32 %s252_s1, 4  ;;  %s134_s2 = int_to_ptr.vmem [resolvable:$true] %s133_s2 }
   0xb   :  { %v212_v25 = vpack.c.bf16 %v33_v23, %v32_v22  ;;  %s225_s21 = scalar_lea.vmem %s134_s2, 128  ;;  %p230_p1 = scmp.lt.s32.totalorder %s134_s2, %s134_s2 }
   0xc   :  { %201 = vmatpush3.bf16.msra.mxu0 %v200_v10  ;;  %v18_v28 = vadd.f32 1e-06, %v17_v24  ;;  %p226_p0 = scmp.ne.s32.totalorder %s134_s2, %s225_s21  ;;  %p231_p2 = scmp.lt.s32.totalorder %s225_s21, %s225_s21 }
   0xd   :  { %202 = vmatprep.subr.bf16.mxu0 %v249_v3 }
   0xe   :  { %v19_v30 = vmul.f32 %v18_v28, %v18_v28  ;;  %p232_p3 = por %p231_p2, %p230_p1 }
  0x10   :  { %204 = vmatpush3.bf16.msra.mxu0 %v203_v13  ;;  %p233_p4 = pnand %p232_p3, %p226_p0 }
  0x11   :  { %205 = vmatprep.subr.bf16.mxu0 %v249_v3 }
  0x14   :  { %207 = vmatpush3.bf16.msra.mxu0 %v206_v16 }
  0x15   :  { %208 = vmatprep.subr.bf16.mxu0 %v249_v3 }
  0x18   :  { %210 = vmatpush3.bf16.msra.mxu0 %v209_v19 }
  0x19   :  { %211 = vmatprep.subr.bf16.mxu0 %v249_v3 }
  0x1c   :  { %213 = vmatpush3.bf16.msra.mxu0 %v212_v25 }
  0x1d   :  { %214 = vmatprep.subr.bf16.mxu0 %v249_v3 }
  0x20   :  { %216 = vmatpush3.bf16.msra.mxu0 %v215_v29 }
  0x23   :  { %191 = vmatmul.mubr.f32.vlgmr.msra.gmra.mrb[0].mxu0 %v19_v30 }
  0xf6   :  { %v102_v31 = vpop.f32.mrb[0].mxu0 }
  0xf7   :  { %223 = vrsqrt.f32 %v102_v31  ;;  %v192_v32 = vpop.f32.mrb[1].mxu0  ;;  %vm108_vm1 = vcmp.eq.f32.partialorder %v102_v31, inf  ;;  %v111_v35 = vand.u32 2147483648, %v102_v31  ;;  %vm110_vm3 = vcmp.eq.f32.partialorder %v102_v31, 0.0 }
 0x101   :  { %v224_v33 = vpop.eup %223 }
 0x102   :  { %v107_v34 = vmul.f32 %v224_v33, %v102_v31 }
 0x104   :  { %v109_v36 = vsel %vm108_vm1, %v102_v31, %v107_v34 }
 0x105   :  { %v112_v37 = vsel %vm110_vm3, %v111_v35, %v109_v36 }
 0x106   :  { %v114_v38 = vsel %vm113_vm2, %v112_v37, 0.0 }
 0x107   :  { %115 = vadd.xlane.f32.xlu0 %v114_v38 }
 0x194   :  { %v116_v39 = vpop.xlane.xlu0 %115 }
 0x195   :  { %v117_v40 = vrot.slane %v116_v39, 4 }
 0x197   :  { %v118_v41 = vadd.f32 %v117_v40, %v116_v39 }
 0x199   :  { %v119_v42 = vrot.slane %v118_v41, 2 }
 0x19b   :  { %v120_v43 = vadd.f32 %v119_v42, %v118_v41 }
 0x19d   :  { %v121_v44 = vrot.slane %v120_v43, 1 }
 0x19f   :  { %v122_v45 = vadd.f32 %v121_v44, %v120_v43 }
 0x1a1   :  { %217 = vpush %v122_v45 }
 0x1d2   :  { %s218_s20 = spop %217 }
 0x1d3   :  { %v124_v46 = vstv %s218_s20 }
 0x1d4   :  { %126 = vst [vmem:[#allocation2] sm:$0xff] %v124_v46 }
 0x1d5   :  { %236 = shalt.err (!%p233_p4)
}
 0x1d6   :  { %s237_s24 = scalar_lea.hbm %s342_s3, 128 }
 0x1d7   :  { %p238_p5 = scmp.ne.s32.totalorder %s342_s3, %s237_s24  ;;  %p241_p6 = scmp.lt.u32.totalorder %s237_s24, %s342_s3 }
 0x1d9   :  { %p243_p7 = pnand %p241_p6, %p238_p5 }
 0x1db   :  { %246 = shalt.err (!%p243_p7)
}
 0x1dc   :  { %136 = dma.vmem_to_hbm [thread:$0]  %s134_s2, 128, %s342_s3, [#allocation3]  }
 0x1dd   :  { %247 = dma.done.wait [#allocation3], 128  }
 0x1de   :  { %248 = vsyncadd [#allocation3], 4294967168 }
 0x1df   :  { %140 = vsyncpa [#allocation3], 1 }

</bundles_post_ra>
